<compile_context>
chip_gen: v7x
topology: tpu7x:2x2x1
jax: 0.10.0
libtpu: 0.0.40
codegen_flags: <defaults>
</compile_context>

<pallas_src>
import functools

import jax
import jax.numpy as jnp
from jax.experimental import pallas as pl
from jax.experimental.pallas import tpu as pltpu

LANE = 128
NODE_PAD = 256          # node-dim padding granularity (>=2 row blocks for v7x)
MAX_TM = 1024           # row-block cap
MAX_TK = 2048           # reduction-block cap (A columns)
VMEM_LIMIT = 32 * 1024 * 1024   # safe on v5e/v6e/v7x; working set << this


def _round_up(v, m):
    return (v + m - 1) // m * m


def _pick_tile(n_p, cap, min_blocks):
    """Largest multiple of LANE dividing n_p, <= cap, leaving >= min_blocks blocks."""
    best = LANE
    t = LANE
    limit = min(cap, n_p // min_blocks)
    while t <= limit:
        if n_p % t == 0:
            best = t
        t += LANE
    return best


# ----------------------------------------------------------------------------
# Kernels
# ----------------------------------------------------------------------------
def _transform_kernel(x_ref, wl_ref, y_ref):
    """y = x @ Wl  (neighbor-message transform; stored bf16, feeds A @ y)."""
    y_ref[...] = jnp.dot(x_ref[...], wl_ref[...],
                         preferred_element_type=jnp.float32).astype(y_ref.dtype)


def _aggregate_kernel(a_ref, y_ref, x_ref, wr_ref, b_ref, dinv_ref, o_ref,
                      acc_ref, *, relu):
    """out = act( dinv * (A @ y) + x @ Wr + b ), reduced over column blocks of A.

    A arrives as int8 counts and is upcast to bf16 just before the MXU matmul.
    The root/self term is computed in the finalize branch (x row block and Wr
    stay VMEM-resident via constant index_maps), so z never touches HBM.
    """
    k = pl.program_id(1)
    part = jnp.dot(a_ref[...].astype(jnp.bfloat16), y_ref[...],
                   preferred_element_type=jnp.float32)

    @pl.when(k == 0)
    def _():
        acc_ref[...] = part            # first block: write, no zero-fill + add

    @pl.when(k > 0)
    def _():
        acc_ref[...] += part

    @pl.when(k == pl.num_programs(1) - 1)
    def _():
        z = jnp.dot(x_ref[...], wr_ref[...],
                    preferred_element_type=jnp.float32) + b_ref[...]
        out = acc_ref[...] * dinv_ref[...] + z
        if relu:
            out = jnp.maximum(out, 0.0)
        o_ref[...] = out.astype(o_ref.dtype)


# ----------------------------------------------------------------------------
# One SAGEConv layer = transform pass + tiled aggregation pass
# ----------------------------------------------------------------------------
def _sage_layer(a, dinv, x, wl, wr, b, *, relu, out_dtype, tm, tk):
    n_p = a.shape[0]
    fin_p = x.shape[1]
    fout_p = wl.shape[1]

    # Pass 1: y = x @ Wl (weight resident via constant index_map).
    y = pl.pallas_call(
        _transform_kernel,
        out_shape=jax.ShapeDtypeStruct((n_p, fout_p), jnp.bfloat16),
        grid=(n_p // tm,),
        in_specs=[pl.BlockSpec((tm, fin_p), lambda i: (i, 0)),
                  pl.BlockSpec((fin_p, fout_p), lambda i: (0, 0))],
        out_specs=pl.BlockSpec((tm, fout_p), lambda i: (i, 0)),
        compiler_params=pltpu.CompilerParams(
            dimension_semantics=("parallel",),
            vmem_limit_bytes=VMEM_LIMIT),
    )(x, wl)

    # Pass 2: tiled mean aggregation + fused root term.
    out_itemsize = jnp.dtype(out_dtype).itemsize
    cost = pl.CostEstimate(
        flops=2 * n_p * n_p * fout_p + 2 * n_p * fin_p * fout_p,
        transcendentals=0,
        bytes_accessed=int(n_p * n_p                          # int8 A
                           + n_p * fout_p * 2 * (n_p // tm)   # y re-read / row blk
                           + n_p * fin_p * 2                  # x row blocks
                           + n_p * 4                          # dinv
                           + fin_p * fout_p * 2               # Wr
                           + n_p * fout_p * out_itemsize),    # output
    )
    out = pl.pallas_call(
        functools.partial(_aggregate_kernel, relu=relu),
        out_shape=jax.ShapeDtypeStruct((n_p, fout_p), out_dtype),
        grid=(n_p // tm, n_p // tk),
        in_specs=[pl.BlockSpec((tm, tk), lambda i, k: (i, k)),         # A (int8)
                  pl.BlockSpec((tk, fout_p), lambda i, k: (k, 0)),     # y
                  pl.BlockSpec((tm, fin_p), lambda i, k: (i, 0)),      # x row blk
                  pl.BlockSpec((fin_p, fout_p), lambda i, k: (0, 0)),  # Wr
                  pl.BlockSpec((1, fout_p), lambda i, k: (0, 0)),      # bias
                  pl.BlockSpec((tm, 1), lambda i, k: (i, 0))],         # 1/deg
        out_specs=pl.BlockSpec((tm, fout_p), lambda i, k: (i, 0)),
        scratch_shapes=[pltpu.VMEM((tm, fout_p), jnp.float32)],
        compiler_params=pltpu.CompilerParams(
            dimension_semantics=("parallel", "arbitrary"),
            vmem_limit_bytes=VMEM_LIMIT),
        cost_estimate=cost,
    )(a, y, x, wr, b, dinv)
    return out


# ----------------------------------------------------------------------------
# Wrapper (plain-JAX glue: adjacency build, padding, dtype casts)
# ----------------------------------------------------------------------------
def _pad2(w, rows, cols, dtype):
    out = jnp.zeros((rows, cols), dtype)
    return out.at[:w.shape[0], :w.shape[1]].set(w.astype(dtype))


def gnn_encoder(x, edge_index, params):
    """x: [N, Fin] float32, edge_index: [2, E] int32 (row 0 = src, row 1 = dst)."""
    n, fin = x.shape
    h_dim = params["w1l"].shape[1]
    o_dim = params["w2l"].shape[1]

    # Padded sizes: feature dims to 128 lanes; nodes to a tight multiple of 256
    # (so the parallel row axis always has >=2 blocks of >=128 for v7x's 2 TCs),
    # then tile sizes chosen from divisors of n_p.
    fin_p = _round_up(fin, LANE)
    h_p = _round_up(h_dim, LANE)
    o_p = _round_up(o_dim, LANE)
    n_p = _round_up(n, NODE_PAD)
    tm = _pick_tile(n_p, MAX_TM, min_blocks=2)
    tk = _pick_tile(n_p, MAX_TK, min_blocks=1)

    # Unnormalized adjacency counts as int8 (upcast to bf16 inside the kernel);
    # per-row 1/deg from bincount -- no f32 N^2 intermediate is materialized.
    # NOTE: int8 counts assume edge multiplicity <= 127 per (dst, src) pair.
    src, dst = edge_index[0], edge_index[1]
    a = jnp.zeros((n_p, n_p), jnp.int8).at[dst, src].add(jnp.int8(1))
    deg = jnp.bincount(dst, length=n_p).astype(jnp.float32)
    dinv = (1.0 / jnp.maximum(deg, 1.0)).reshape(n_p, 1)

    xp = jnp.zeros((n_p, fin_p), jnp.bfloat16).at[:n, :fin].set(
        x.astype(jnp.bfloat16))

    w1l = _pad2(params["w1l"], fin_p, h_p, jnp.bfloat16)
    w1r = _pad2(params["w1r"], fin_p, h_p, jnp.bfloat16)
    b1 = _pad2(params["b1"], 1, h_p, jnp.float32)
    w2l = _pad2(params["w2l"], h_p, o_p, jnp.bfloat16)
    w2r = _pad2(params["w2r"], h_p, o_p, jnp.bfloat16)
    b2 = _pad2(params["b2"], 1, o_p, jnp.float32)

    h = _sage_layer(a, dinv, xp, w1l, w1r, b1,
                    relu=True, out_dtype=jnp.bfloat16, tm=tm, tk=tk)
    out = _sage_layer(a, dinv, h, w2l, w2r, b2,
                      relu=False, out_dtype=jnp.float32, tm=tm, tk=tk)
    return out[:n, :o_dim]


def init_params(key, in_channels, hidden_channels, out_channels):
    ks = jax.random.split(key, 6)
    scale = 0.1
    return {
        # stored as [in, out] so kernel does x @ W  (== x @ W_pt.T in PyTorch)
        "w1l": scale * jax.random.normal(ks[0], (in_channels, hidden_channels), jnp.float32),
        "w1r": scale * jax.random.normal(ks[1], (in_channels, hidden_channels), jnp.float32),
        "b1":  scale * jax.random.normal(ks[2], (1, hidden_channels), jnp.float32),
        "w2l": scale * jax.random.normal(ks[3], (hidden_channels, out_channels), jnp.float32),
        "w2r": scale * jax.random.normal(ks[4], (hidden_channels, out_channels), jnp.float32),
        "b2":  scale * jax.random.normal(ks[5], (1, out_channels), jnp.float32),
    }


if __name__ == "__main__":
    key = jax.random.PRNGKey(0)
    k_x, k_e, k_p = jax.random.split(key, 3)

    N, Fin, H, O, E = 16, 8, 32, 16, 48

    x = jax.random.normal(k_x, (N, Fin), jnp.float32)
    edge_index = jax.random.randint(k_e, (2, E), 0, N, dtype=jnp.int32)
    params = init_params(k_p, Fin, H, O)

    out = gnn_encoder(x, edge_index, params)
    jax.block_until_ready(out)
    assert out.shape == (N, O)

    # Pure-JAX reference replicating the kernel's bf16 rounding / f32 accumulate.
    bf = lambda t: t.astype(jnp.bfloat16).astype(jnp.float32)
    a_ref = jnp.zeros((N, N), jnp.float32).at[edge_index[1], edge_index[0]].add(1.0)
    dinv_ref = 1.0 / jnp.maximum(a_ref.sum(axis=1, keepdims=True), 1.0)
    x_b = bf(x)
    y1 = bf(x_b @ bf(params["w1l"]))
    h_ref = jnp.maximum(dinv_ref * (bf(a_ref) @ y1)
                        + x_b @ bf(params["w1r"]) + params["b1"], 0.0)
    h_b = bf(h_ref)
    y2 = bf(h_b @ bf(params["w2l"]))
    ref = (dinv_ref * (bf(a_ref) @ y2)
           + h_b @ bf(params["w2r"]) + params["b2"])

    assert jnp.allclose(out, ref, atol=1e-2, rtol=1e-2), (
        float(jnp.max(jnp.abs(out - ref))))

    print("KERNEL_OK")
</pallas_src>

<mosaic_0001>
module attributes {stable_mosaic.version = 11 : i64} {
  func.func @_transform_kernel(%arg0: i32, %arg1: memref<128x128xbf16, #tpu.memory_space<vmem>>, %arg2: memref<128x128xbf16, #tpu.memory_space<vmem>>, %arg3: memref<128x128xbf16, #tpu.memory_space<vmem>>) attributes {dimension_semantics = [#tpu.dimension_semantics<parallel>], iteration_bounds = array<i64: 2>, scalar_prefetch = 0 : i64, scratch_operands = 0 : i64, tpu.core_type = #tpu.core_type<tc>, window_params = [{transform_indices = @transform_0, window_bounds = array<i64: 128, 128>}, {pipeline_mode = #tpu.pipeline_mode<synchronous>, transform_indices = @transform_1, window_bounds = array<i64: 128, 128>}, {transform_indices = @transform_2, window_bounds = array<i64: 128, 128>}]} {
    %c0 = arith.constant 0 : index
    %c0_0 = arith.constant 0 : index
    %0 = vector.load %arg1[%c0, %c0_0] : memref<128x128xbf16, #tpu.memory_space<vmem>>, vector<128x128xbf16>
    %c0_1 = arith.constant 0 : index
    %c0_2 = arith.constant 0 : index
    %1 = vector.load %arg2[%c0_1, %c0_2] : memref<128x128xbf16, #tpu.memory_space<vmem>>, vector<128x128xbf16>
    %cst = arith.constant dense<0.000000e+00> : vector<128x128xf32>
    %2 = tpu.matmul %0, %1, %cst {dimension_numbers = #tpu.dot_dimension_numbers<[1], [0], [0], [1], [0, 0, 1, 1], [], []>} : vector<128x128xbf16>, vector<128x128xbf16>, vector<128x128xf32> -> vector<128x128xf32>
    %3 = arith.truncf %2 : vector<128x128xf32> to vector<128x128xbf16>
    %c0_3 = arith.constant 0 : index
    %c0_4 = arith.constant 0 : index
    %4 = vector.load %arg3[%c0_3, %c0_4] : memref<128x128xbf16, #tpu.memory_space<vmem>>, vector<128x128xbf16>
    tpu.vector_store %arg3[%c0_3, %c0_4], %3 {strides = array<i32>} : memref<128x128xbf16, #tpu.memory_space<vmem>>, vector<128x128xbf16>,
    return
  }
  func.func @transform_0(%arg0: i32) -> (i32, i32) {
    %c0_i32 = arith.constant 0 : i32
    %c0_i32_0 = arith.constant 0 : i32
    return %arg0, %c0_i32 : i32, i32
  }
  func.func @transform_1(%arg0: i32) -> (i32, i32) {
    %c0_i32 = arith.constant 0 : i32
    %c0_i32_0 = arith.constant 0 : i32
    %c0_i32_1 = arith.constant 0 : i32
    return %c0_i32, %c0_i32_0 : i32, i32
  }
  func.func @transform_2(%arg0: i32) -> (i32, i32) {
    %c0_i32 = arith.constant 0 : i32
    %c0_i32_0 = arith.constant 0 : i32
    return %arg0, %c0_i32 : i32, i32
  }
}

</mosaic_0001>

<bundles_post_ra>
// kernel: tpu_custom_call.1
= control target key start
LH: loop header
LB: loop body
LE: loop exit
PB: predicated region body
PF: predicated region fallthrough
CT: control target
= control target key end

     0   :  { %7 = vsyncpa [#allocation3], 0  ;;  %s1209_s0 = inlined_call_operand.hbm [shape: bf16[256,128], index: 0, kind: input, shape index: {}]   ;;  %s1210_s1 = inlined_call_operand.hbm [shape: bf16[128,128], index: 1, kind: input, shape index: {}]   ;;  %s1211_s2 = inlined_call_operand.hbm [shape: bf16[256,128], index: 2, kind: output, shape index: {}]  }
   0x1   :  { %9 = vsyncpa [#allocation3 + $0x1], 0 }
   0x2   :  { %10 = vsyncpa [#allocation6], 0 }
   0x3   :  { %11 = vsyncpa [#allocation4], 0 }
   0x4   :  { %13 = vsyncpa [#allocation4 + $0x1], 0  ;;  %s988_s9 = smov 0   ;;  %s990_s10 = smov 0  }
   0x5   :  { %s992_s11 = smov 0   ;;  %s994_s12 = smov 0  }
   0x6 LB: > { %s1009_s13 = sadd.s32 4294967295, %s964_s12   ;;  %s582_s14 = sadd.s32 4294967294, %s964_s12   ;;  %s964_s12 = sphi %s994_s12, %s1231_s12   ;;  %s960_s11 = sphi %s992_s11, %s1230_s11   ;;  %s956_s10 = sphi %s990_s10, %s1229_s10   ;;  %s952_s9 = sphi %s988_s9, %s1228_s9  }
   0x7   : > { %p39_p0 = scmp.ne.s32.totalorder %s956_s10, %s952_s9  ;;  %p1212_p1 = scmp.eq.s32.totalorder %s1009_s13, 0 }
   0x8   : > { %p90_p3 = scmp.eq.s32.totalorder %s582_s14, 1  ;;  %p583_p5 = scmp.ge.s32.totalorder %s964_s12, 1 }
   0x9   : > { %p1018_p4 = por %p1212_p1, %p39_p0  ;;  %p97_p7 = scmp.lt.s32.totalorder %s964_s12, 3 }
   0xa   : > { %p1023_p6 = por %p90_p3, %p39_p0  ;;  %s966_s18 = smov [#allocation5]  }
   0xb   : > { %s1215_s15 = scalar_select %p1018_p4, 1, 0 }
   0xc   : > { %s1216_s16 = scalar_select %p1023_p6, 1, 0 }
   0xd   : > { %p1028_p8 = pnand %p583_p5, %p97_p7  ;;  %s109_s19 = sshll.u32 %s966_s18, 4  ;;  %s1032_s19 = int_to_ptr.vmem [resolvable:$true] %s109_s19 }
   0xe   : > { %s1044_s21 = sadd.s32 1, %s964_s12   ;;  %s26_s22 = sadd.s32 1, %s960_s11 }
   0xf   : > { %s1217_s17 = scalar_select %p1028_p8, 1, 0 }
  0x10   : > { %p767_p9 = pneg %p1028_p8  ;;  %s23_s23 = ssub.s32 %s964_s12, %s1044_s21 }
  0x11   : > { %s836_s26 = scalar_lea.hbm %s1210_s1, 1024 }
  0x12   : > { %p1039_p11 = pnand %p767_p9, %p1212_p1  ;;  %p837_p12 = scmp.ne.s32.totalorder %s1210_s1, %s836_s26 }
  0x13   : > { %p843_p5 = scmp.lt.u32.totalorder %s836_s26, %s1210_s1 }
  0x14   : > { %p838_p13 = pneg %p1039_p11 }
  0x16   : > { %p839_p0 = pnand %p838_p13, %p837_p12 }
  0x18   : > { %p840_p3 = pneg %p839_p0 }
  0x1a   : > { %p845_p7 = pnand %p843_p5, %p840_p3 }
  0x1c   : > { %848 = shalt.err (!%p845_p7)
}
  0x1d   : > { %s849_s3 = scalar_lea.vmem %s1032_s19, 1024  ;;  %p857_p2 = scmp.lt.s32.totalorder %s1032_s19, %s1032_s19 }
  0x1e   : > { %p850_p9 = scmp.ne.s32.totalorder %s1032_s19, %s849_s3  ;;  %p858_p6 = scmp.lt.s32.totalorder %s849_s3, %s849_s3 }
  0x20   : > { %p852_p10 = pnand %p850_p9, %p838_p13  ;;  %p859_p4 = por %p858_p6, %p857_p2 }
  0x22   : > { %p853_p1 = pneg %p852_p10 }
  0x24   : > { %p860_p8 = pnand %p859_p4, %p853_p1 }
  0x26   : > { %863 = shalt.err (!%p860_p8)
}
  0x27   : > { %s967_s4 = smov 64   ;;  %s968_s5 = smov 4  }
  0x28   : > { %770 = dma.hbm_to_vmem [thread:$0]  (!%p1039_p11), %s1210_s1, 1024, %s1032_s19, [#allocation6], %s967_s4, %s967_s4, %s968_s5  }
  0x29   : > { %p24_p1 = scmp.eq.s32.totalorder %s23_s23, 0  ;;  %p33_p2 = scmp.ne.s32.totalorder %s960_s11, %s956_s10 }
  0x2a   : > { %p34_p4 = scmp.eq.s32.totalorder %s964_s12, 0  ;;  %p780_p6 = scmp.lt.s32.totalorder %s964_s12, 2 }
  0x2b   : > { %s1078_s8 = scalar_select %p24_p1, %s960_s11, %s26_s22  }
  0x2c   : > { %p35_p8 = por %p34_p4, %p33_p2  ;;  %p1219_p10 = scmp.eq.s32.totalorder %s1009_s13, 1 }
  0x2d   : > { %s123_s18 = sand.u32 1, %s960_s11   ;;  %s630_s20 = sshll.u32 %s964_s12, 10 }
  0x2e   : > { %p1082_p12 = por %p1219_p10, %p33_p2  ;;  %s586_s24 = sshll.u32 %s123_s18, 6 }
  0x2f   : > { %s1091_s27 = scalar_lea.hbm %s1209_s0, %s630_s20  ;;  %s127_s19 = scalar_lea.vmem [#allocation2], %s586_s24 }
  0x30   : > { %s134_s22 = sshll.u32 %s127_s19, 4  ;;  %p1093_p11 = pnand %p780_p6, %p35_p8  ;;  %s1097_s22 = int_to_ptr.vmem [resolvable:$true] %s134_s22 }
  0x31   : > { %s1099_s28 = scalar_lea.sflag [#allocation3], %s123_s18  ;;  %s864_s29 = scalar_lea.hbm %s1091_s27, 1024 }
  0x32   : > { %p865_p13 = scmp.ne.s32.totalorder %s1091_s27, %s864_s29  ;;  %p866_p0 = pneg %p1093_p11 }
  0x33   : > { %s869_s6 = scalar_lea.hbm %s1209_s0, 2048  ;;  %p870_p7 = scmp.lt.u32.totalorder %s1091_s27, %s1209_s0 }
  0x34   : > { %p867_p3 = pnand %p866_p0, %p865_p13  ;;  %p871_p9 = scmp.lt.u32.totalorder %s869_s6, %s864_s29 }
  0x35   : > { %p873_p2 = scmp.lt.u32.totalorder %s864_s29, %s1091_s27 }
  0x36   : > { %p868_p5 = pneg %p867_p3  ;;  %p872_p1 = por %p871_p9, %p870_p7 }
  0x38   : > { %p874_p4 = por %p873_p2, %p872_p1 }
  0x3a   : > { %p875_p6 = pnand %p874_p4, %p868_p5 }
  0x3c   : > { %878 = shalt.err (!%p875_p6)
}
  0x3d   : > { %s879_s18 = scalar_lea.vmem %s1097_s22, 1024  ;;  %s969_s24 = smov [#allocation2]  }
  0x3e   : > { %p880_p8 = scmp.ne.s32.totalorder %s1097_s22, %s879_s18  ;;  %s884_s25 = sshll.u32 %s969_s24, 4  ;;  %s885_s25 = int_to_ptr.vmem [resolvable:$false] %s884_s25 }
  0x3f   : > { %s886_s26 = scalar_lea.vmem %s885_s25, 2048  ;;  %p887_p3 = scmp.lt.s32.totalorder %s1097_s22, %s885_s25 }
  0x40   : > { %p882_p10 = pnand %p880_p8, %p866_p0  ;;  %p888_p7 = scmp.lt.s32.totalorder %s886_s26, %s879_s18 }
  0x42   : > { %p883_p13 = pneg %p882_p10  ;;  %p889_p9 = por %p888_p7, %p887_p3 }
  0x44   : > { %p890_p1 = pnand %p889_p9, %p883_p13 }
  0x46   : > { %893 = shalt.err (!%p890_p1)
}
  0x47   : > { %774 = dma.hbm_to_vmem [thread:$0]  (!%p1093_p11), %s1091_s27, 1024, %s1097_s22, %s1099_s28, %s967_s4, %s967_s4, %s968_s5  }
  0x48   : > { %p1222_p0 = scmp.ne.s32.totalorder %s1217_s17, 0 }
  0x49   : > { %s1133_s19 = sand.u32 (!%p1222_p0), 1, %s956_s10   ;;  %p1223_p5 = scmp.ne.s32.totalorder (!%p1222_p0), %s1215_s15, 0 }
  0x4a   : > { %146 = sbr.rel (%p1222_p0) target bundleno = 358 (0x166), region = 28  ;;  %s590_s29 = sshll.u32 (!%p1222_p0), %s1133_s19, 6 }
  0x4b   : > { %s149_s30 = scalar_lea.sflag (!%p1222_p0), [#allocation3], %s1133_s19  ;;  %s1139_s23 = scalar_lea.vmem (!%p1222_p0), [#allocation2], %s590_s29 }
  0x51   : > { %939 = dma.done.wait (%p1223_p5), %s149_s30, 1024  }
  0x52   : > { %941 = vsyncadd (%p1223_p5), %s149_s30, 4294966272  ;;  %p1224_p11 = scmp.eq.s32.totalorder %s1009_s13, 0 }
  0x54   : > { %943 = dma.done.wait (%p1224_p11), [#allocation6], 1024   ;;  %p1225_p2 = pmov %p1224_p11 }
  0x55   : > { %v820_v0 = vld [vmem:[#allocation5] sm:$0xff]   ;;  %v821_v1 = vld [vmem:[#allocation5 + $0x8] sm:$0xff]   ;;  %v822_v2 = vld [vmem:[#allocation5 + $0x10] sm:$0xff]   ;;  %s176_s15 = scalar_lea.vmem [#allocation7], %s590_s29  ;;  %s647_s4 = sshll.u32 %s1009_s13, 10 }
  0x56   : > { %945 = vsyncadd (%p1225_p2), [#allocation6], 4294966272  ;;  %711 = vmatprep.subr.bf16.mxu0 %v820_v0  ;;  %743 = vmatprep.subr.bf16.mxu1 %v820_v0  ;;  %v823_v3 = vld [vmem:[#allocation5 + $0x18] sm:$0xff]   ;;  %v828_v4 = vld [vmem:[%s1139_s23] sm:$0xff]   ;;  %s499_s17 = sshll.u32 %s176_s15, 4  ;;  %s1165_s22 = scalar_lea.hbm %s1211_s2, %s647_s4  ;;  %s1160_s17 = int_to_ptr.vmem [resolvable:$true] %s499_s17 }
  0x57   : > { %712 = vmatpush3.bf16.msra.mxu0 %v820_v0  ;;  %751 = vmatpush3.bf16.msra.mxu1 %v820_v0  ;;  %v829_v5 = vld [vmem:[%s1139_s23 + $0x20] sm:$0xff]   ;;  %v825_v7 = vld [vmem:[#allocation5 + $0x28] sm:$0xff]   ;;  %v826_v8 = vld [vmem:[#allocation5 + $0x30] sm:$0xff]   ;;  %s486_s13 = scalar_lea.sflag [#allocation4], %s1133_s19  ;;  %s894_s28 = scalar_lea.vmem %s1160_s17, 1024 }
  0x58   : > { %713 = vmatprep.subr.bf16.mxu0 %v821_v1  ;;  %744 = vmatprep.subr.bf16.mxu1 %v821_v1  ;;  %v824_v6 = vld [vmem:[#allocation5 + $0x20] sm:$0xff]   ;;  %v827_v9 = vld [vmem:[#allocation5 + $0x38] sm:$0xff]   ;;  %v830_v10 = vld [vmem:[%s1139_s23 + $0x8] sm:$0xff]   ;;  %p895_p4 = scmp.ne.s32.totalorder %s1160_s17, %s894_s28  ;;  %s970_s3 = smov [#allocation7]  }
  0x59   : > { %727 = vmatprep.mubr.bf16.mxu0 %v828_v4  ;;  %735 = vmatprep.mubr.bf16.mxu1 %v829_v5  ;;  %v831_v11 = vld [vmem:[%s1139_s23 + $0x28] sm:$0xff]   ;;  %v832_v12 = vld [vmem:[%s1139_s23 + $0x10] sm:$0xff]   ;;  %v834_v14 = vld [vmem:[%s1139_s23 + $0x18] sm:$0xff]   ;;  %s898_s6 = sshll.u32 %s970_s3, 4  ;;  %s899_s6 = int_to_ptr.vmem [resolvable:$false] %s898_s6 }
  0x5a   : > { %v833_v13 = vld [vmem:[%s1139_s23 + $0x30] sm:$0xff]   ;;  %v835_v15 = vld [vmem:[%s1139_s23 + $0x38] sm:$0xff]   ;;  %p896_p6 = pnand %p895_p4, %p1082_p12  ;;  %s900_s7 = scalar_lea.vmem %s899_s6, 2048 }
  0x5b   : > { %714 = vmatpush3.bf16.msra.mxu0 %v821_v1  ;;  %752 = vmatpush3.bf16.msra.mxu1 %v821_v1  ;;  %p901_p10 = scmp.lt.s32.totalorder %s1160_s17, %s899_s6  ;;  %p902_p13 = scmp.lt.s32.totalorder %s900_s7, %s894_s28 }
  0x5c   : > { %715 = vmatprep.subr.bf16.mxu0 %v822_v2  ;;  %745 = vmatprep.subr.bf16.mxu1 %v822_v2  ;;  %p897_p8 = pneg %p896_p6 }
  0x5d   : > { %p903_p3 = por %p902_p13, %p901_p10 }
  0x5f   : > { %716 = vmatpush3.bf16.msra.mxu0 %v822_v2  ;;  %753 = vmatpush3.bf16.msra.mxu1 %v822_v2  ;;  %p904_p7 = pnand %p903_p3, %p897_p8 }
  0x60   : > { %717 = vmatprep.subr.bf16.mxu0 %v823_v3  ;;  %746 = vmatprep.subr.bf16.mxu1 %v823_v3 }
  0x63   : > { %718 = vmatpush3.bf16.msra.mxu0 %v823_v3  ;;  %754 = vmatpush3.bf16.msra.mxu1 %v823_v3 }
  0x64   : > { %719 = vmatprep.subr.bf16.mxu0 %v824_v6  ;;  %747 = vmatprep.subr.bf16.mxu1 %v824_v6 }
  0x67   : > { %720 = vmatpush3.bf16.msra.mxu0 %v824_v6  ;;  %755 = vmatpush3.bf16.msra.mxu1 %v824_v6 }
  0x68   : > { %721 = vmatprep.subr.bf16.mxu0 %v825_v7  ;;  %748 = vmatprep.subr.bf16.mxu1 %v825_v7 }
  0x6b   : > { %722 = vmatpush3.bf16.msra.mxu0 %v825_v7  ;;  %756 = vmatpush3.bf16.msra.mxu1 %v825_v7 }
  0x6c   : > { %723 = vmatprep.subr.bf16.mxu0 %v826_v8  ;;  %749 = vmatprep.subr.bf16.mxu1 %v826_v8 }
  0x6f   : > { %724 = vmatpush3.bf16.msra.mxu0 %v826_v8  ;;  %757 = vmatpush3.bf16.msra.mxu1 %v826_v8 }
  0x70   : > { %725 = vmatprep.subr.bf16.mxu0 %v827_v9  ;;  %750 = vmatprep.subr.bf16.mxu1 %v827_v9 }
  0x73   : > { %726 = vmatpush3.bf16.msra.mxu0 %v827_v9  ;;  %758 = vmatpush3.bf16.msra.mxu1 %v827_v9 }
  0x76   : > { %728 = vmatmul.mubr.bf16.vlgmr.msra.gmra.mrb[0].mxu0 %v830_v10  ;;  %736 = vmatmul.mubr.bf16.vlgmr.msra.gmra.mrb[0].mxu1 %v831_v11 }
  0x77   : > { %731 = vmatprep.mubr.bf16.mxu0 %v832_v12  ;;  %739 = vmatprep.mubr.bf16.mxu1 %v833_v13 }
  0x7e   : > { %732 = vmatmul.mubr.bf16.gmra.mrb[4].mxu0 %v834_v14  ;;  %740 = vmatmul.mubr.bf16.gmra.mrb[4].mxu1 %v835_v15 }
 0x149   : > { %v729_v16 = vpop.f32.mrb[0].mxu0  ;;  %v737_v17 = vpop.f32.mrb[0].mxu1 }
 0x14a   : > { %v342_v18 = vpop.f32.mrb[1].mxu0  ;;  %v374_v19 = vpop.f32.mrb[1].mxu1 }
 0x14b   : > { %v730_v20 = vpop.f32.mrb[2].mxu0  ;;  %v738_v21 = vpop.f32.mrb[2].mxu1 }
 0x14c   : > { %v656_v22 = vpack.c.bf16 %v730_v20, %v729_v16  ;;  %v676_v23 = vpack.c.bf16 %v738_v21, %v737_v17  ;;  %v345_v24 = vpop.f32.mrb[3].mxu0  ;;  %v377_v25 = vpop.f32.mrb[3].mxu1 }
 0x14d   : > { %v651_v26 = vpack.c.bf16 %v345_v24, %v342_v18  ;;  %v671_v27 = vpack.c.bf16 %v377_v25, %v374_v19 }
 0x14e   : > { %688 = vst [vmem:[%s176_s15 + $0x8] sm:$0xff] %v656_v22   ;;  %692 = vst [vmem:[%s176_s15 + $0x28] sm:$0xff] %v676_v23  }
 0x14f   : > { %652 = vst [vmem:[%s176_s15] sm:$0xff] %v651_v26   ;;  %691 = vst [vmem:[%s176_s15 + $0x20] sm:$0xff] %v671_v27  }
 0x151   : > { %v733_v28 = vpop.f32.mrb[4].mxu0  ;;  %v741_v29 = vpop.f32.mrb[4].mxu1 }
 0x152   : > { %v358_v30 = vpop.f32.mrb[5].mxu0  ;;  %v390_v31 = vpop.f32.mrb[5].mxu1 }
 0x153   : > { %v734_v32 = vpop.f32.mrb[6].mxu0  ;;  %v742_v33 = vpop.f32.mrb[6].mxu1 }
 0x154   : > { %v666_v34 = vpack.c.bf16 %v734_v32, %v733_v28  ;;  %v686_v35 = vpack.c.bf16 %v742_v33, %v741_v29  ;;  %v361_v36 = vpop.f32.mrb[7].mxu0  ;;  %v393_v37 = vpop.f32.mrb[7].mxu1 }
 0x155   : > { %v661_v38 = vpack.c.bf16 %v361_v36, %v358_v30  ;;  %v681_v39 = vpack.c.bf16 %v393_v37, %v390_v31 }
 0x156   : > { %690 = vst [vmem:[%s176_s15 + $0x18] sm:$0xff] %v666_v34   ;;  %694 = vst [vmem:[%s176_s15 + $0x38] sm:$0xff] %v686_v35  }
 0x157   : > { %689 = vst [vmem:[%s176_s15 + $0x10] sm:$0xff] %v661_v38   ;;  %693 = vst [vmem:[%s176_s15 + $0x30] sm:$0xff] %v681_v39  }
 0x158   : > { %907 = shalt.err (!%p904_p7)
}
 0x159   : > { %s908_s20 = scalar_lea.hbm %s1165_s22, 1024  ;;  %s912_s25 = scalar_lea.hbm %s1211_s2, 2048 }
 0x15a   : > { %p909_p9 = scmp.ne.s32.totalorder %s1165_s22, %s908_s20  ;;  %p913_p5 = scmp.lt.u32.totalorder %s1165_s22, %s1211_s2 }
 0x15b   : > { %p914_p11 = scmp.lt.u32.totalorder %s912_s25, %s908_s20  ;;  %p916_p4 = scmp.lt.u32.totalorder %s908_s20, %s1165_s22 }
 0x15c   : > { %p910_p1 = pnand %p909_p9, %p1082_p12 }
 0x15d   : > { %p915_p2 = por %p914_p11, %p913_p5 }
 0x15e   : > { %p911_p0 = pneg %p910_p1 }
 0x15f   : > { %p917_p6 = por %p916_p4, %p915_p2 }
 0x161   : > { %p918_p8 = pnand %p917_p6, %p911_p0 }
 0x163   : > { %921 = shalt.err (!%p918_p8)
}
 0x164   : > { %s971_s30 = smov 64   ;;  %s972_s23 = smov 4  }
 0x165   : > { %765 = dma.vmem_to_hbm [thread:$0]  (%p1082_p12), %s1160_s17, 1024, %s1165_s22, %s486_s13, %s971_s30, %s971_s30, %s972_s23  }
 0x166 PF: > { %s514_s15 = sand.u32 1, %s952_s9   ;;  %p1226_p10 = scmp.ne.s32.totalorder %s1216_s16, 0 }
 0x167   : > { %p1227_p13 = scmp.ge.s32.totalorder %s964_s12, 2  ;;  %s515_s4 = scalar_lea.sflag [#allocation4], %s514_s15 }
 0x169   : > { %p776_p3 = pnand %p1227_p13, %p1226_p10 }
 0x16b   : > { %947 = dma.done.wait (!%p776_p3), %s515_s4, 1024  }
 0x16c   : > { %949 = vsyncadd (!%p776_p3), %s515_s4, 4294966272  ;;  %p16_p7 = scmp.ge.s32.totalorder %s1044_s21, 4   ;;  %s1228_s9 = smov %s956_s10 }
 0x16d   : > { %s1229_s10 = smov %s960_s11  ;;  %s1230_s11 = smov %s1078_s8 }
 0x16e   : > { %s1231_s12 = smov %s1044_s21  ;;  %18 = sbr.rel (!%p16_p7) target bundleno = 6 (0x6), region = 77 }
 0x175   :  { %520 = vsyncpa [#allocation3], 1 }
 0x176   :  { %522 = vsyncpa [#allocation3 + $0x1], 1 }
 0x177   :  { %523 = vsyncpa [#allocation6], 1 }
 0x178   :  { %524 = vsyncpa [#allocation4], 1 }
 0x179   :  { %526 = vsyncpa [#allocation4 + $0x1], 1 }

</bundles_post_ra>
